<compile_context>
chip_gen: v7x
topology: tpu7x:2x2x1
jax: 0.10.0
libtpu: 0.0.40
codegen_flags: <defaults>
</compile_context>

<pallas_src>
import functools

import jax
import jax.numpy as jnp
from jax.experimental import pallas as pl
from jax.experimental.pallas import tpu as pltpu


def _blur_kernel(w_ref, x_ref, o_ref, *, H, W, KH, KW, pad):
    """One batch tile per grid step.

    w_ref: (bt*Cout, KH*KW*bt*Cin) f32 block-diagonal weight (VMEM)
    x_ref: (bt*Cin,  H*W) input rows, flattened spatial on lanes (VMEM)
    o_ref: (bt*Cout, H*W) output rows, same layout (VMEM)
    """
    HW = H * W
    x = x_ref[...].astype(jnp.float32)                     # (R, HW), R = bt*Cin
    R = x.shape[0]

    # Row / column index of every flattened pixel (lane-only, computed once).
    q = jax.lax.broadcasted_iota(jnp.int32, (R, HW), 1)
    if W & (W - 1) == 0:                                   # power of two: shift/and
        rr = q >> (W.bit_length() - 1)
        cc = q & (W - 1)
    else:
        rr = q // W
        cc = q - rr * W

    # Per-tap shifted + halo-masked copies of the merged input tile.
    taps = []
    for kh in range(KH):
        for kw in range(KW):
            dh, dw = kh - pad, kw - pad
            s = dh * W + dw                                # flat-index offset of this tap
            shifted = x if s == 0 else pltpu.roll(x, shift=(-s) % HW, axis=1)
            conds = []
            if dh > 0:
                conds.append(rr < H - dh)
            elif dh < 0:
                conds.append(rr >= -dh)
            if dw > 0:
                conds.append(cc < W - dw)
            elif dw < 0:
                conds.append(cc >= -dw)
            if conds:
                valid = conds[0]
                for c in conds[1:]:
                    valid = jnp.logical_and(valid, c)
                shifted = jnp.where(valid, shifted, 0.0)
            taps.append(shifted)

    # Stack taps (sublane-aligned: each tap contributes R rows, R % 8 == 0 here) and
    # do the whole channel mix as ONE MXU matmul, then ONE lane-dense store.
    tap_mat = jnp.concatenate(taps, axis=0)                # (KH*KW*R, HW)
    out = jnp.dot(w_ref[...], tap_mat, preferred_element_type=jnp.float32)
    o_ref[...] = out.astype(o_ref.dtype)


def blur_forward(x_nchw, weight_oihw, stride=1, padding=1, batch_tile=None):
    """Equivalent of BlurModule.forward (Conv2d, bias=False), NCHW in / NCHW out."""
    N, Cin, H, W = x_nchw.shape
    Cout, Cin_w, KH, KW = weight_oihw.shape
    assert Cin == Cin_w
    # Fast same-size path (matches the module defaults: 3x3, stride=1, padding=1).
    # TODO(synk): a strided-output index_map would be needed for stride > 1 configs.
    assert stride == 1 and 2 * padding == KH - 1 and 2 * padding == KW - 1

    if batch_tile is None:
        batch_tile = N                                     # single chunky step
    assert N % batch_tile == 0
    HW = H * W

    x_flat = x_nchw.reshape(N * Cin, HW)                   # free reshape (contiguous NCHW)

    # Block-diagonal weight so the batch dim rides the matmul's M/K axes:
    # w_big[n*Cout+co, t*(bt*Cin)+n*Cin+ci] = weight[co, ci, kh, kw], t = kh*KW+kw.
    w32 = weight_oihw.astype(jnp.float32)
    eye = jnp.eye(batch_tile, dtype=jnp.float32)
    w_big = jnp.concatenate(
        [jnp.kron(eye, w32[:, :, kh, kw]) for kh in range(KH) for kw in range(KW)],
        axis=1,
    )                                                      # (bt*Cout, KH*KW*bt*Cin)

    kernel = functools.partial(_blur_kernel, H=H, W=W, KH=KH, KW=KW, pad=padding)

    n_steps = N // batch_tile
    out_flat = pl.pallas_call(
        kernel,
        out_shape=jax.ShapeDtypeStruct((N * Cout, HW), x_nchw.dtype),
        grid=(n_steps,),
        in_specs=[
            # Small weight tile, resident in VMEM (same block every step).
            pl.BlockSpec(
                (batch_tile * Cout, KH * KW * batch_tile * Cin), lambda i: (0, 0)
            ),
            # One sublane-full batch tile per step.
            pl.BlockSpec((batch_tile * Cin, HW), lambda i: (i, 0)),
        ],
        out_specs=pl.BlockSpec((batch_tile * Cout, HW), lambda i: (i, 0)),
        compiler_params=pltpu.CompilerParams(dimension_semantics=("parallel",)),
    )(w_big, x_flat)

    return out_flat.reshape(N, Cout, H, W)


if __name__ == "__main__":
    # Module config (matches BlurModule defaults).
    in_channels, out_channels = 4, 4
    kernel_size = (3, 3)
    stride, padding = 1, 1

    # nn.init.constant_(weight, 1 / (kh * kw)); bias=False.
    weight = jnp.full(
        (out_channels, in_channels, kernel_size[0], kernel_size[1]),
        1.0 / (kernel_size[0] * kernel_size[1]),
        dtype=jnp.float32,
    )

    key = jax.random.PRNGKey(0)
    x = jax.random.normal(key, (2, 4, 16, 16), dtype=jnp.float32)

    blur = jax.jit(blur_forward, static_argnames=("stride", "padding"))
    out = jax.block_until_ready(blur(x, weight, stride=stride, padding=padding))

    ref = jax.lax.conv_general_dilated(
        x,
        weight,
        window_strides=(stride, stride),
        padding=[(padding, padding), (padding, padding)],
        dimension_numbers=("NCHW", "OIHW", "NCHW"),
        precision=jax.lax.Precision.HIGHEST,
    )
    assert out.shape == ref.shape == (2, 4, 16, 16)
    assert jnp.allclose(out, ref, atol=1e-4, rtol=1e-4)

    # Extra check with a non-constant weight (exercises the general channel mix).
    w2 = jax.random.normal(jax.random.PRNGKey(1), weight.shape, dtype=jnp.float32) * 0.1
    out2 = jax.block_until_ready(blur(x, w2, stride=stride, padding=padding))
    ref2 = jax.lax.conv_general_dilated(
        x,
        w2,
        window_strides=(stride, stride),
        padding=[(padding, padding), (padding, padding)],
        dimension_numbers=("NCHW", "OIHW", "NCHW"),
        precision=jax.lax.Precision.HIGHEST,
    )
    assert jnp.allclose(out2, ref2, atol=1e-4, rtol=1e-4)

    print("KERNEL_OK")
</pallas_src>

<mosaic_0001>
module attributes {stable_mosaic.version = 11 : i64} {
  func.func @_blur_kernel(%arg0: i32, %arg1: memref<8x72xf32, #tpu.memory_space<vmem>>, %arg2: memref<8x256xf32, #tpu.memory_space<vmem>>, %arg3: memref<8x256xf32, #tpu.memory_space<vmem>>) attributes {dimension_semantics = [#tpu.dimension_semantics<parallel>], iteration_bounds = array<i64: 1>, scalar_prefetch = 0 : i64, scratch_operands = 0 : i64, tpu.core_type = #tpu.core_type<tc>, window_params = [{pipeline_mode = #tpu.pipeline_mode<synchronous>, transform_indices = @transform_0, window_bounds = array<i64: 8, 72>}, {transform_indices = @transform_1, window_bounds = array<i64: 8, 256>}, {transform_indices = @transform_2, window_bounds = array<i64: 8, 256>}]} {
    %c0 = arith.constant 0 : index
    %c0_0 = arith.constant 0 : index
    %0 = vector.load %arg2[%c0, %c0_0] : memref<8x256xf32, #tpu.memory_space<vmem>>, vector<8x256xf32>
    %1 = tpu.iota {dimensions = array<i32: 1>} : vector<8x256xi32>
    %c4_i32 = arith.constant 4 : i32
    %2 = vector.broadcast %c4_i32 : i32 to vector<8x256xi32>
    %3 = arith.shrsi %1, %2 : vector<8x256xi32>
    %c15_i32 = arith.constant 15 : i32
    %4 = vector.broadcast %c15_i32 : i32 to vector<8x256xi32>
    %5 = arith.andi %1, %4 : vector<8x256xi32>
    %c17_i32 = arith.constant 17 : i32
    %6 = tpu.dynamic_rotate %0 by %c17_i32 dim 1 : vector<8x256xf32>, i32 -> vector<8x256xf32>
    %c1_i32 = arith.constant 1 : i32
    %7 = vector.broadcast %c1_i32 : i32 to vector<8x256xi32>
    %8 = arith.cmpi sge, %3, %7 : vector<8x256xi32>
    %c1_i32_1 = arith.constant 1 : i32
    %9 = vector.broadcast %c1_i32_1 : i32 to vector<8x256xi32>
    %10 = arith.cmpi sge, %5, %9 : vector<8x256xi32>
    %11 = arith.andi %8, %10 : vector<8x256xi1>
    %cst = arith.constant 0.000000e+00 : f32
    %12 = vector.broadcast %cst : f32 to vector<8x256xf32>
    %13 = arith.select %11, %6, %12 : vector<8x256xi1>, vector<8x256xf32>
    %c16_i32 = arith.constant 16 : i32
    %14 = tpu.dynamic_rotate %0 by %c16_i32 dim 1 : vector<8x256xf32>, i32 -> vector<8x256xf32>
    %c1_i32_2 = arith.constant 1 : i32
    %15 = vector.broadcast %c1_i32_2 : i32 to vector<8x256xi32>
    %16 = arith.cmpi sge, %3, %15 : vector<8x256xi32>
    %cst_3 = arith.constant 0.000000e+00 : f32
    %17 = vector.broadcast %cst_3 : f32 to vector<8x256xf32>
    %18 = arith.select %16, %14, %17 : vector<8x256xi1>, vector<8x256xf32>
    %c15_i32_4 = arith.constant 15 : i32
    %19 = tpu.dynamic_rotate %0 by %c15_i32_4 dim 1 : vector<8x256xf32>, i32 -> vector<8x256xf32>
    %c1_i32_5 = arith.constant 1 : i32
    %20 = vector.broadcast %c1_i32_5 : i32 to vector<8x256xi32>
    %21 = arith.cmpi sge, %3, %20 : vector<8x256xi32>
    %c15_i32_6 = arith.constant 15 : i32
    %22 = vector.broadcast %c15_i32_6 : i32 to vector<8x256xi32>
    %23 = arith.cmpi slt, %5, %22 : vector<8x256xi32>
    %24 = arith.andi %21, %23 : vector<8x256xi1>
    %cst_7 = arith.constant 0.000000e+00 : f32
    %25 = vector.broadcast %cst_7 : f32 to vector<8x256xf32>
    %26 = arith.select %24, %19, %25 : vector<8x256xi1>, vector<8x256xf32>
    %c1_i32_8 = arith.constant 1 : i32
    %27 = tpu.dynamic_rotate %0 by %c1_i32_8 dim 1 : vector<8x256xf32>, i32 -> vector<8x256xf32>
    %c1_i32_9 = arith.constant 1 : i32
    %28 = vector.broadcast %c1_i32_9 : i32 to vector<8x256xi32>
    %29 = arith.cmpi sge, %5, %28 : vector<8x256xi32>
    %cst_10 = arith.constant 0.000000e+00 : f32
    %30 = vector.broadcast %cst_10 : f32 to vector<8x256xf32>
    %31 = arith.select %29, %27, %30 : vector<8x256xi1>, vector<8x256xf32>
    %c255_i32 = arith.constant 255 : i32
    %32 = tpu.dynamic_rotate %0 by %c255_i32 dim 1 : vector<8x256xf32>, i32 -> vector<8x256xf32>
    %c15_i32_11 = arith.constant 15 : i32
    %33 = vector.broadcast %c15_i32_11 : i32 to vector<8x256xi32>
    %34 = arith.cmpi slt, %5, %33 : vector<8x256xi32>
    %cst_12 = arith.constant 0.000000e+00 : f32
    %35 = vector.broadcast %cst_12 : f32 to vector<8x256xf32>
    %36 = arith.select %34, %32, %35 : vector<8x256xi1>, vector<8x256xf32>
    %c241_i32 = arith.constant 241 : i32
    %37 = tpu.dynamic_rotate %0 by %c241_i32 dim 1 : vector<8x256xf32>, i32 -> vector<8x256xf32>
    %c15_i32_13 = arith.constant 15 : i32
    %38 = vector.broadcast %c15_i32_13 : i32 to vector<8x256xi32>
    %39 = arith.cmpi slt, %3, %38 : vector<8x256xi32>
    %c1_i32_14 = arith.constant 1 : i32
    %40 = vector.broadcast %c1_i32_14 : i32 to vector<8x256xi32>
    %41 = arith.cmpi sge, %5, %40 : vector<8x256xi32>
    %42 = arith.andi %39, %41 : vector<8x256xi1>
    %cst_15 = arith.constant 0.000000e+00 : f32
    %43 = vector.broadcast %cst_15 : f32 to vector<8x256xf32>
    %44 = arith.select %42, %37, %43 : vector<8x256xi1>, vector<8x256xf32>
    %c240_i32 = arith.constant 240 : i32
    %45 = tpu.dynamic_rotate %0 by %c240_i32 dim 1 : vector<8x256xf32>, i32 -> vector<8x256xf32>
    %c15_i32_16 = arith.constant 15 : i32
    %46 = vector.broadcast %c15_i32_16 : i32 to vector<8x256xi32>
    %47 = arith.cmpi slt, %3, %46 : vector<8x256xi32>
    %cst_17 = arith.constant 0.000000e+00 : f32
    %48 = vector.broadcast %cst_17 : f32 to vector<8x256xf32>
    %49 = arith.select %47, %45, %48 : vector<8x256xi1>, vector<8x256xf32>
    %c239_i32 = arith.constant 239 : i32
    %50 = tpu.dynamic_rotate %0 by %c239_i32 dim 1 : vector<8x256xf32>, i32 -> vector<8x256xf32>
    %c15_i32_18 = arith.constant 15 : i32
    %51 = vector.broadcast %c15_i32_18 : i32 to vector<8x256xi32>
    %52 = arith.cmpi slt, %3, %51 : vector<8x256xi32>
    %c15_i32_19 = arith.constant 15 : i32
    %53 = vector.broadcast %c15_i32_19 : i32 to vector<8x256xi32>
    %54 = arith.cmpi slt, %5, %53 : vector<8x256xi32>
    %55 = arith.andi %52, %54 : vector<8x256xi1>
    %cst_20 = arith.constant 0.000000e+00 : f32
    %56 = vector.broadcast %cst_20 : f32 to vector<8x256xf32>
    %57 = arith.select %55, %50, %56 : vector<8x256xi1>, vector<8x256xf32>
    %58 = tpu.concatenate %13, %18, %26, %31, %0, %36, %44, %49, %57 in 0 : vector<8x256xf32>, vector<8x256xf32>, vector<8x256xf32>, vector<8x256xf32>, vector<8x256xf32>, vector<8x256xf32>, vector<8x256xf32>, vector<8x256xf32>, vector<8x256xf32> -> vector<72x256xf32>
    %c0_21 = arith.constant 0 : index
    %c0_22 = arith.constant 0 : index
    %59 = vector.load %arg1[%c0_21, %c0_22] : memref<8x72xf32, #tpu.memory_space<vmem>>, vector<8x72xf32>
    %cst_23 = arith.constant dense<0.000000e+00> : vector<8x256xf32>
    %60 = tpu.matmul %59, %58, %cst_23 {dimension_numbers = #tpu.dot_dimension_numbers<[1], [0], [0], [1], [0, 0, 1, 1], [], []>} : vector<8x72xf32>, vector<72x256xf32>, vector<8x256xf32> -> vector<8x256xf32>
    %c0_24 = arith.constant 0 : index
    %c0_25 = arith.constant 0 : index
    %61 = vector.load %arg3[%c0_24, %c0_25] : memref<8x256xf32, #tpu.memory_space<vmem>>, vector<8x256xf32>
    tpu.vector_store %arg3[%c0_24, %c0_25], %60 {strides = array<i32>} : memref<8x256xf32, #tpu.memory_space<vmem>>, vector<8x256xf32>,
    return
  }
  func.func @transform_0(%arg0: i32) -> (i32, i32) {
    %c0_i32 = arith.constant 0 : i32
    %c0_i32_0 = arith.constant 0 : i32
    %c0_i32_1 = arith.constant 0 : i32
    return %c0_i32, %c0_i32_0 : i32, i32
  }
  func.func @transform_1(%arg0: i32) -> (i32, i32) {
    %c0_i32 = arith.constant 0 : i32
    %c0_i32_0 = arith.constant 0 : i32
    return %arg0, %c0_i32 : i32, i32
  }
  func.func @transform_2(%arg0: i32) -> (i32, i32) {
    %c0_i32 = arith.constant 0 : i32
    %c0_i32_0 = arith.constant 0 : i32
    return %arg0, %c0_i32 : i32, i32
  }
}

</mosaic_0001>

<bundles_post_ra>
// kernel: blur_forward.1
= control target key start
LH: loop header
LB: loop body
LE: loop exit
PB: predicated region body
PF: predicated region fallthrough
CT: control target
= control target key end

     0   :  { %s276_s13 = smov 15   ;;  %s277_s14 = smov 17   ;;  %v284_v3 = vmov 0.0   ;;  %v13_v4 = vlaneseq  ;;  %s465_s1 = inlined_call_operand.vmem [shape: f32[8,256], index: 1, kind: input, shape index: {}]   ;;  %s466_s0 = inlined_call_operand.vmem [shape: f32[8,72], index: 0, kind: input, shape index: {}]   ;;  %s467_s2 = inlined_call_operand.vmem [shape: f32[8,256], index: 2, kind: output, shape index: {}]  }
   0x1   :  { %v304_v0 = vld [vmem:[%s465_s1] sm:$0xff]  ;;  %v309_v1 = vld [vmem:[%s465_s1 + $0x8] sm:$0xff]  ;;  %s278_s15 = smov 1   ;;  %s279_s16 = smov 16   ;;  %177 = vmatprep.mubr.f32.mxu0 %v284_v3 }
   0x2   :  { %v251_v2 = vpack.i.bf16 %v309_v1, %v304_v0  ;;  %s280_s17 = smov 127   ;;  %s281_s18 = smov 113   ;;  %v315_v5 = vand.u32 127, %v13_v4  ;;  %v108_v4 = vld [vmem:[%s466_s0] sm:$0xff] }
   0x3   :  { %s282_s19 = smov 112   ;;  %s283_s20 = smov 111  }
   0x4   :  { %252 = vrot.lane.b32.xlu1 %v251_v2, %s276_s13  ;;  %242 = vrot.lane.b32.xlu0 %v251_v2, %s277_s14  ;;  %v15_v6 = vadd.s32 128, %v315_v5  ;;  %v16_v9 = vshra.s32 %v315_v5, 4  ;;  %v18_v10 = vand.u32 15, %v315_v5  ;;  %vm48_vm5 = vcmp.lt.s32.totalorder %v315_v5, 15 }
   0x5   :  { %vm24_vm6 = vcmp.lt.s32.totalorder %v315_v5, 17  ;;  %vm61_vm8 = vcmp.lt.s32.totalorder %v315_v5, 1  ;;  %vm39_vm9 = vcmp.lt.s32.totalorder %v315_v5, 16  ;;  %vm70_vm13 = vcmp.lt.s32.totalorder %v315_v5, 127 }
   0x6   :  { %v17_v7 = vshra.s32 %v15_v6, 4  ;;  %v19_v8 = vand.u32 15, %v15_v6  ;;  %vm330_vm2 = vcmp.ge.s32.totalorder %v16_v9, 1  ;;  %vm334_vm3 = vcmp.ge.s32.totalorder %v18_v10, 1 }
   0x7   :  { %vm31_vm10 = vmand %vm330_vm2, %vm334_vm3  ;;  %vm354_vm11 = vcmp.lt.s32.totalorder %v18_v10, 15 }
   0x8   :  { %257 = vrot.lane.b32.xlu1 %v251_v2, %s278_s15  ;;  %247 = vrot.lane.b32.xlu0 %v251_v2, %s279_s16  ;;  %vm320_vm0 = vcmp.ge.s32.totalorder %v17_v7, 1  ;;  %vm324_vm1 = vcmp.ge.s32.totalorder %v19_v8, 1  ;;  %vm344_vm7 = vcmp.lt.s32.totalorder %v19_v8, 15  ;;  %vm384_vm15 = vmpackc.low %vm330_vm2, %vm31_vm10  ;;  %vm285_vm10 = vmmov 1  }
   0x9   :  { %vm32_vm4 = vmand %vm320_vm0, %vm324_vm1 }
   0xa   :  { %vm360_vm12 = vmpackc.low %vm320_vm0, %vm32_vm4  ;;  %vm79_vm4 = vcmp.lt.s32.totalorder %v315_v5, 113 }
   0xb   :  { %vm54_vm14 = vmand %vm320_vm0, %vm344_vm7 }
   0xc   :  { %262 = vrot.lane.b32.xlu0 %v251_v2, %s280_s17  ;;  %267 = vrot.lane.b32.xlu1 %v251_v2, %s281_s18  ;;  %vm53_vm0 = vmand %vm330_vm2, %vm354_vm11 }
  0x10   :  { %272 = vrot.lane.b32.xlu0 %v251_v2, %s282_s19  ;;  %97 = vrot.lane.b32.xlu1 %v304_v0, %s283_s20 }
  0x14   :  { %99 = vrot.lane.b32.xlu0 %v309_v1, %s283_s20 }
  0x76   :  { %v253_v13 = vpop.permute.xlu1 %252  ;;  %v243_v14 = vpop.permute.xlu0 %242 }
  0x77   :  { %v255_v17 = vunpack.i.h.bf16 %v253_v13  ;;  %v254_v18 = vunpack.i.l.bf16 %v253_v13  ;;  %v245_v19 = vunpack.i.h.bf16 %v243_v14  ;;  %v244_v20 = vunpack.i.l.bf16 %v243_v14 }
  0x79   :  { %v49_v30 = vsel %vm48_vm5, %v254_v18, %v255_v17  ;;  %v25_v31 = vsel %vm24_vm6, %v244_v20, %v245_v19  ;;  %v26_v34 = vsel %vm24_vm6, %v245_v19, %v244_v20  ;;  %vm214_vm6 = vmpackc.low %vm324_vm1, %vm54_vm14  ;;  %v50_v45 = vsel %vm48_vm5, %v255_v17, %v254_v18 }
  0x7a   :  { %v258_v22 = vpop.permute.xlu1 %257  ;;  %v248_v23 = vpop.permute.xlu0 %247  ;;  %vm217_vm5 = vmpackc.low %vm334_vm3, %vm53_vm0  ;;  %vm101_vm0 = vcmp.lt.s32.totalorder %v315_v5, 111 }
  0x7b   :  { %v260_v25 = vunpack.i.h.bf16 %v258_v22  ;;  %v259_v26 = vunpack.i.l.bf16 %v258_v22  ;;  %v250_v27 = vunpack.i.h.bf16 %v248_v23  ;;  %v249_v28 = vunpack.i.l.bf16 %v248_v23  ;;  %vm223_vm14 = vmpackc.low %vm354_vm11, %vm285_vm10 }
  0x7d   :  { %v62_v32 = vsel %vm61_vm8, %v259_v26, %v260_v25  ;;  %v40_v33 = vsel %vm39_vm9, %v249_v28, %v250_v27  ;;  %v41_v35 = vsel %vm39_vm9, %v250_v27, %v249_v28  ;;  %v63_v46 = vsel %vm61_vm8, %v260_v25, %v259_v26 }
  0x7e   :  { %v207_v37 = vpack.c.bf16 %v40_v33, %v25_v31  ;;  %v210_v38 = vpack.c.bf16 %v41_v35, %v26_v34  ;;  %v263_v39 = vpop.permute.xlu0 %262  ;;  %v268_v40 = vpop.permute.xlu1 %267  ;;  %v213_v47 = vpack.c.bf16 %v62_v32, %v49_v30  ;;  %vm401_vm9 = vcmp.lt.s32.totalorder %v17_v7, 15 }
  0x7f   :  { %v265_v41 = vunpack.i.h.bf16 %v263_v39  ;;  %v264_v42 = vunpack.i.l.bf16 %v263_v39  ;;  %v270_v43 = vunpack.i.h.bf16 %v268_v40  ;;  %v269_v44 = vunpack.i.l.bf16 %v268_v40  ;;  %vm85_vm2 = vmand %vm401_vm9, %vm324_vm1 }
  0x80   :  { %209 = vmatprep.subr.msk.bf16.mxu0 %vm360_vm12, %v207_v37  ;;  %vm92_vm8 = vcmp.lt.s32.totalorder %v315_v5, 112  ;;  %vm220_vm12 = vmpackc.low %vm344_vm7, %vm285_vm10  ;;  %v216_v53 = vpack.c.bf16 %v63_v46, %v50_v45 }
  0x81   :  { %212 = vmatpush1.bf16.msk.msra.mxu0 %vm384_vm15, %v210_v38  ;;  %v72_v49 = vsel %vm70_vm13, %v265_v41, %v264_v42  ;;  %v71_v50 = vsel %vm70_vm13, %v264_v42, %v265_v41  ;;  %v81_v54 = vsel %vm79_vm4, %v270_v43, %v269_v44  ;;  %vm430_vm13 = vcmp.lt.s32.totalorder %v16_v9, 15  ;;  %vm226_vm1 = vmpackc.low %vm401_vm9, %vm85_vm2 }
  0x82   :  { %v219_v51 = vpack.c.bf16 %v72_v49, %v309_v1  ;;  %215 = vmatprep.subr.msk.bf16.mxu0 %vm214_vm6, %v213_v47  ;;  %v273_v52 = vpop.permute.xlu0 %272  ;;  %v222_v58 = vpack.c.bf16 %v71_v50, %v304_v0  ;;  %v80_v60 = vsel %vm79_vm4, %v269_v44, %v270_v43  ;;  %vm84_vm15 = vmand %vm430_vm13, %vm334_vm3  ;;  %v98_v63 = vpop.permute.xlu1 %97 }
  0x83   :  { %v275_v55 = vunpack.i.h.bf16 %v273_v52  ;;  %v274_v56 = vunpack.i.l.bf16 %v273_v52  ;;  %vm229_vm4 = vmpackc.low %vm430_vm13, %vm84_vm15 }
  0x84   :  { %vm105_vm6 = vmand %vm401_vm9, %vm344_vm7 }
  0x85   :  { %218 = vmatpush1.bf16.msk.msra.mxu0 %vm217_vm5, %v216_v53  ;;  %v94_v59 = vsel %vm92_vm8, %v275_v55, %v274_v56  ;;  %v93_v61 = vsel %vm92_vm8, %v274_v56, %v275_v55  ;;  %vm104_vm3 = vmand %vm430_vm13, %vm354_vm11  ;;  %vm109_vm5 = vcmask 588800  }
  0x86   :  { %v225_v62 = vpack.c.bf16 %v94_v59, %v81_v54  ;;  %221 = vmatprep.subr.msk.bf16.mxu0 %vm220_vm12, %v219_v51  ;;  %v100_v0 = vpop.permute.xlu0 %99  ;;  %v228_v1 = vpack.c.bf16 %v93_v61, %v80_v60 }
  0x87   :  { %v103_v2 = vsel %vm101_vm0, %v100_v0, %v98_v63  ;;  %v102_v3 = vsel %vm101_vm0, %v98_v63, %v100_v0 }
  0x89   :  { %224 = vmatpush1.bf16.msk.msra.mxu0 %vm223_vm14, %v222_v58 }
  0x8a   :  { %227 = vmatprep.subr.msk.bf16.mxu0 %vm226_vm1, %v225_v62 }
  0x8d   :  { %230 = vmatpush1.bf16.msk.msra.mxu0 %vm229_vm4, %v228_v1 }
  0x8e   :  { %204 = vmatprep.subr.msk.mxu0 %vm105_vm6, %v103_v2 }
  0x91   :  { %205 = vmatpush1.msk.msra.mxu0 %vm104_vm3, %v102_v3 }
  0x92   :  { %206 = vmatmul.mubr.msk.f32.vlgmr.msra.gmra.mrb[0].mxu0 %vm109_vm5, %v108_v4 }
 0x165   :  { %v179_v5 = vpop.f32.mrb[0].mxu0 }
 0x166   :  { %184 = vst [vmem:[%s467_s2] sm:$0xff] %v179_v5  ;;  %v181_v6 = vpop.f32.mrb[1].mxu0 }
 0x167   :  { %185 = vst [vmem:[%s467_s2 + $0x8] sm:$0xff] %v181_v6 }

</bundles_post_ra>
